<compile_context>
chip_gen: v5e
topology: v5e:2x2
jax: 0.10.0
libtpu: 0.0.40
codegen_flags: <defaults>
</compile_context>

<pallas_src>
import functools

import jax
import jax.numpy as jnp
from jax.experimental import pallas as pl
from jax.experimental.pallas import tpu as pltpu


def _choose_d_tile(D: int, HW: int, bytes_cap: int = 4 * 1024 * 1024) -> int:
    """Largest D-tile (multiple of 8 dividing D, or D itself) fitting the cap."""
    if D * HW * 4 <= bytes_cap or D <= 8:
        return D
    best = None
    for td in range(8, D, 8):
        if D % td == 0 and td * HW * 4 <= bytes_cap:
            best = td
    return best if best is not None else D


def _grad_loss_kernel(x_ref, out_ref, carry_ref, *, penalty: str, H: int, W: int,
                      TD: int, inv_nd: float, inv_nh: float, inv_nw: float):
    """One grid step: a lane-dense (TD, H*W) slab of a single (b, c) volume."""
    HW = H * W
    j = pl.program_id(1)  # D-tile index within this volume ("arbitrary" axis)

    x = x_ref[...].astype(jnp.float32)  # (TD, HW)

    # First D-tile of each (b, c) volume: zero the resident accumulator block
    # and reset the D-seam carry so the seam term below is exactly zero.
    @pl.when(j == 0)
    def _():
        out_ref[...] = jnp.zeros_like(out_ref)
        carry_ref[...] = x[0:1, :]

    if penalty == "l2":
        pen = lambda d: d * d            # |d|^2 == d*d -> drop the abs
    else:
        pen = lambda d: jnp.abs(d)

    # ---- diff along D (sublane axis), tiled with a one-row carry ----
    seam = x[0:1, :] - carry_ref[...]    # pair (j*TD - 1, j*TD); zero when j==0
    sum_d = jnp.sum(pen(seam))
    if TD > 1:
        sum_d = sum_d + jnp.sum(pen(x[1:, :] - x[:-1, :]))
    carry_ref[...] = x[TD - 1:TD, :]     # last row, consumed by the next tile

    # ---- diffs along H and W: lane rotations (XLU) + boundary masks ----
    lane = jax.lax.broadcasted_iota(jnp.int32, (TD, HW), 1)   # k = h*W + w

    # H-diff: rotate lanes by W. The mask is derived from the rotated index
    # map itself so it is independent of the rotation direction convention
    # and automatically drops lanes that wrapped around the volume.
    x_h = pltpu.roll(x, HW - W, 1)
    src_h = pltpu.roll(lane, HW - W, 1)               # source lane of x_h[:, k]
    mask_h = jnp.abs(src_h - lane) == W               # true H-neighbours only
    sum_h = jnp.sum(jnp.where(mask_h, pen(x_h - x), 0.0))
    if H == 2:                                        # each pair seen twice
        sum_h = sum_h * 0.5

    # W-diff: rotate lanes by 1; additionally require both lanes in the same
    # H-row (excludes pairs that cross a W boundary).
    x_w = pltpu.roll(x, HW - 1, 1)
    src_w = pltpu.roll(lane, HW - 1, 1)
    mask_w = (jnp.abs(src_w - lane) == 1) & (jnp.maximum(src_w, lane) % W != 0)
    sum_w = jnp.sum(jnp.where(mask_w, pen(x_w - x), 0.0))
    if H * W == 2 and W == 2:                         # degenerate wrap case
        sum_w = sum_w * 0.5

    # Normalize with the static per-direction denominators and accumulate into
    # the resident lane-dense output block (one unmasked vst per step).
    term = sum_d * inv_nd + sum_h * inv_nh + sum_w * inv_nw
    out_ref[...] += jnp.full(out_ref.shape, term, dtype=jnp.float32)


def grad_loss(x: jax.Array, penalty: str = "l2", d_tile: int | None = None) -> jax.Array:
    """Pallas implementation of GradLoss.forward for x of shape [B, 3, D, H, W]."""
    assert penalty in ("l1", "l2"), "Unsupported penalty method in GradLoss"
    B, C, D, H, W = x.shape
    n = B * C
    HW = H * W
    x2 = x.reshape(n, D, HW)             # lane-dense: last dim = H*W

    if d_tile is None:
        TD = _choose_d_tile(D, HW)
    else:
        assert D % d_tile == 0 and (d_tile == D or d_tile % 8 == 0)
        TD = d_tile
    nt = D // TD

    # Same denominators as torch.mean on each difference tensor (NaN if empty,
    # matching torch.mean of an empty tensor).
    n_d = n * (D - 1) * H * W
    n_h = n * D * (H - 1) * W
    n_w = n * D * H * (W - 1)
    inv = lambda v: (1.0 / v) if v > 0 else float("nan")

    kernel = functools.partial(_grad_loss_kernel, penalty=penalty, H=H, W=W, TD=TD,
                               inv_nd=inv(n_d), inv_nh=inv(n_h), inv_nw=inv(n_w))

    tile_bytes = TD * HW * 4
    vmem_limit = int(min(48 * 1024 * 1024,
                         max(32 * 1024 * 1024, 2 * tile_bytes + 8 * 1024 * 1024)))

    out = pl.pallas_call(
        kernel,
        out_shape=jax.ShapeDtypeStruct((n, 8, 128), jnp.float32),
        grid_spec=pltpu.PrefetchScalarGridSpec(
            num_scalar_prefetch=0,
            grid=(n, nt),                # (b*c) parallel, D-tiles sequential
            in_specs=[pl.BlockSpec((None, TD, HW), lambda i, j: (i, j, 0))],
            # Same block index across j -> resident accumulator per (b, c).
            out_specs=pl.BlockSpec((1, 8, 128), lambda i, j: (i, 0, 0)),
            scratch_shapes=[pltpu.VMEM((1, HW), jnp.float32)],   # D-seam carry
        ),
        compiler_params=pltpu.CompilerParams(
            dimension_semantics=("parallel", "arbitrary"),
            vmem_limit_bytes=vmem_limit,
        ),
    )(x2)

    return jnp.sum(out[:, 0, 0]) / 3.0


def _grad_loss_ref(x: jax.Array, penalty: str = "l2") -> jax.Array:
    """Pure-JAX reference mirroring the PyTorch forward."""
    xf = x.astype(jnp.float32)
    dh = jnp.abs(xf[:, :, 1:, :, :] - xf[:, :, :-1, :, :])
    dw = jnp.abs(xf[:, :, :, 1:, :] - xf[:, :, :, :-1, :])
    dd = jnp.abs(xf[:, :, :, :, 1:] - xf[:, :, :, :, :-1])
    if penalty == "l2":
        dh, dw, dd = dh ** 2, dw ** 2, dd ** 2
    return (jnp.mean(dh) + jnp.mean(dw) + jnp.mean(dd)) / 3.0


if __name__ == "__main__":
    key = jax.random.PRNGKey(0)

    # Small deformation field: [B, 3, D, H, W]
    B, C, D, H, W = 2, 3, 8, 16, 16
    x = jax.random.normal(key, (B, C, D, H, W), dtype=jnp.float32)

    for penalty in ("l2", "l1"):
        out = jax.block_until_ready(grad_loss(x, penalty=penalty))
        ref = _grad_loss_ref(x, penalty=penalty)
        if not jnp.allclose(out, ref, rtol=1e-5, atol=1e-6):
            raise AssertionError(
                f"Mismatch for penalty={penalty}: kernel={out}, ref={ref}")

    # Exercise the D-tiled path (seam carry across D-tiles): D=16, TD=8 -> 2 tiles.
    x_big = jax.random.normal(jax.random.PRNGKey(0), (2, 3, 16, 16, 16),
                              dtype=jnp.float32)
    for penalty in ("l2", "l1"):
        out = jax.block_until_ready(grad_loss(x_big, penalty=penalty, d_tile=8))
        ref = _grad_loss_ref(x_big, penalty=penalty)
        if not jnp.allclose(out, ref, rtol=1e-5, atol=1e-6):
            raise AssertionError(
                f"Tiled mismatch for penalty={penalty}: kernel={out}, ref={ref}")

    print("KERNEL_OK")
</pallas_src>

<mosaic_0001>
module attributes {stable_mosaic.version = 11 : i64} {
  func.func @_grad_loss_kernel(%arg0: i32, %arg1: i32, %arg2: memref<1x8x256xf32, #tpu.memory_space<vmem>>, %arg3: memref<1x8x128xf32, #tpu.memory_space<vmem>>, %arg4: memref<1x256xf32, #tpu.memory_space<vmem>>) attributes {dimension_semantics = [#tpu.dimension_semantics<parallel>, #tpu.dimension_semantics<arbitrary>], iteration_bounds = array<i64: 6, 1>, scalar_prefetch = 0 : i64, scratch_operands = 1 : i64, tpu.core_type = #tpu.core_type<tc>, window_params = [{transform_indices = @transform_0, window_bounds = array<i64: 1, 8, 256>}, {transform_indices = @transform_1, window_bounds = array<i64: 1, 8, 128>}]} {
    %c0 = arith.constant 0 : index
    %c0_0 = arith.constant 0 : index
    %c0_1 = arith.constant 0 : index
    %0 = vector.load %arg2[%c0, %c0_0, %c0_1] : memref<1x8x256xf32, #tpu.memory_space<vmem>>, vector<1x8x256xf32>
    %1 = vector.shape_cast %0 : vector<1x8x256xf32> to vector<8x256xf32>
    %c0_i32 = arith.constant 0 : i32
    %2 = arith.cmpi eq, %arg1, %c0_i32 : i32
    %3 = arith.extui %2 : i1 to i32
    %c0_i32_2 = arith.constant 0 : i32
    %4 = arith.cmpi ne, %3, %c0_i32_2 : i32
    scf.if %4 {
      %cst_30 = arith.constant 0.000000e+00 : f32
      %82 = vector.broadcast %cst_30 : f32 to vector<1x8x128xf32>
      %c0_31 = arith.constant 0 : index
      %c0_32 = arith.constant 0 : index
      %c0_33 = arith.constant 0 : index
      %83 = vector.load %arg3[%c0_31, %c0_32, %c0_33] : memref<1x8x128xf32, #tpu.memory_space<vmem>>, vector<1x8x128xf32>
      tpu.vector_store %arg3[%c0_31, %c0_32, %c0_33], %82 {strides = array<i32>} : memref<1x8x128xf32, #tpu.memory_space<vmem>>, vector<1x8x128xf32>,
      %84 = vector.extract_strided_slice %1 {offsets = [0, 0], sizes = [1, 256], strides = [1, 1]} : vector<8x256xf32> to vector<1x256xf32>
      %c0_34 = arith.constant 0 : index
      %c0_35 = arith.constant 0 : index
      %85 = vector.load %arg4[%c0_34, %c0_35] : memref<1x256xf32, #tpu.memory_space<vmem>>, vector<1x256xf32>
      tpu.vector_store %arg4[%c0_34, %c0_35], %84 {strides = array<i32>} : memref<1x256xf32, #tpu.memory_space<vmem>>, vector<1x256xf32>,
    } else {
    }
    %5 = vector.extract_strided_slice %1 {offsets = [0, 0], sizes = [1, 256], strides = [1, 1]} : vector<8x256xf32> to vector<1x256xf32>
    %c0_3 = arith.constant 0 : index
    %c0_4 = arith.constant 0 : index
    %6 = vector.load %arg4[%c0_3, %c0_4] : memref<1x256xf32, #tpu.memory_space<vmem>>, vector<1x256xf32>
    %7 = arith.subf %5, %6 : vector<1x256xf32>
    %8 = arith.mulf %7, %7 : vector<1x256xf32>
    %9 = vector.shape_cast %8 : vector<1x256xf32> to vector<1x1x256xf32>
    %cst = arith.constant dense<0.000000e+00> : vector<1xf32>
    %10 = vector.multi_reduction <add>, %9, %cst [1, 2] : vector<1x1x256xf32> to vector<1xf32>
    %11 = vector.shape_cast %10 : vector<1xf32> to vector<1x1x1xf32>
    %12 = vector.extract %11[0, 0, 0] : f32 from vector<1x1x1xf32>
    %13 = vector.extract_strided_slice %1 {offsets = [1, 0], sizes = [7, 256], strides = [1, 1]} : vector<8x256xf32> to vector<7x256xf32>
    %14 = vector.extract_strided_slice %1 {offsets = [0, 0], sizes = [7, 256], strides = [1, 1]} : vector<8x256xf32> to vector<7x256xf32>
    %15 = arith.subf %13, %14 : vector<7x256xf32>
    %16 = arith.mulf %15, %15 : vector<7x256xf32>
    %17 = vector.shape_cast %16 : vector<7x256xf32> to vector<1x7x256xf32>
    %cst_5 = arith.constant dense<0.000000e+00> : vector<1xf32>
    %18 = vector.multi_reduction <add>, %17, %cst_5 [1, 2] : vector<1x7x256xf32> to vector<1xf32>
    %19 = vector.shape_cast %18 : vector<1xf32> to vector<1x1x1xf32>
    %20 = vector.extract %19[0, 0, 0] : f32 from vector<1x1x1xf32>
    %21 = arith.addf %12, %20 : f32
    %22 = vector.extract_strided_slice %1 {offsets = [7, 0], sizes = [1, 256], strides = [1, 1]} : vector<8x256xf32> to vector<1x256xf32>
    %c0_6 = arith.constant 0 : index
    %c0_7 = arith.constant 0 : index
    %23 = vector.load %arg4[%c0_6, %c0_7] : memref<1x256xf32, #tpu.memory_space<vmem>>, vector<1x256xf32>
    tpu.vector_store %arg4[%c0_6, %c0_7], %22 {strides = array<i32>} : memref<1x256xf32, #tpu.memory_space<vmem>>, vector<1x256xf32>,
    %24 = tpu.iota {dimensions = array<i32: 1>} : vector<8x256xi32>
    %c240_i32 = arith.constant 240 : i32
    %25 = tpu.dynamic_rotate %1 by %c240_i32 dim 1 : vector<8x256xf32>, i32 -> vector<8x256xf32>
    %c240_i32_8 = arith.constant 240 : i32
    %26 = tpu.dynamic_rotate %24 by %c240_i32_8 dim 1 : vector<8x256xi32>, i32 -> vector<8x256xi32>
    %27 = arith.subi %26, %24 : vector<8x256xi32>
    %28 = math.absi %27 : vector<8x256xi32>
    %c16_i32 = arith.constant 16 : i32
    %29 = vector.broadcast %c16_i32 : i32 to vector<8x256xi32>
    %30 = arith.cmpi eq, %28, %29 : vector<8x256xi32>
    %31 = arith.subf %25, %1 : vector<8x256xf32>
    %32 = arith.mulf %31, %31 : vector<8x256xf32>
    %cst_9 = arith.constant 0.000000e+00 : f32
    %33 = vector.broadcast %cst_9 : f32 to vector<8x256xf32>
    %34 = arith.select %30, %32, %33 : vector<8x256xi1>, vector<8x256xf32>
    %35 = vector.shape_cast %34 : vector<8x256xf32> to vector<1x8x256xf32>
    %cst_10 = arith.constant dense<0.000000e+00> : vector<1xf32>
    %36 = vector.multi_reduction <add>, %35, %cst_10 [1, 2] : vector<1x8x256xf32> to vector<1xf32>
    %37 = vector.shape_cast %36 : vector<1xf32> to vector<1x1x1xf32>
    %38 = vector.extract %37[0, 0, 0] : f32 from vector<1x1x1xf32>
    %c255_i32 = arith.constant 255 : i32
    %39 = tpu.dynamic_rotate %1 by %c255_i32 dim 1 : vector<8x256xf32>, i32 -> vector<8x256xf32>
    %c255_i32_11 = arith.constant 255 : i32
    %40 = tpu.dynamic_rotate %24 by %c255_i32_11 dim 1 : vector<8x256xi32>, i32 -> vector<8x256xi32>
    %41 = arith.subi %40, %24 : vector<8x256xi32>
    %42 = math.absi %41 : vector<8x256xi32>
    %c1_i32 = arith.constant 1 : i32
    %43 = vector.broadcast %c1_i32 : i32 to vector<8x256xi32>
    %44 = arith.cmpi eq, %42, %43 : vector<8x256xi32>
    %45 = arith.maxsi %40, %24 : vector<8x256xi32>
    %c16_i32_12 = arith.constant 16 : i32
    %c0_i32_13 = arith.constant 0 : i32
    %46 = arith.cmpi eq, %c16_i32_12, %c0_i32_13 : i32
    %c1_i32_14 = arith.constant 1 : i32
    %47 = arith.select %46, %c1_i32_14, %c16_i32_12 : i32
    %48 = vector.broadcast %47 : i32 to vector<8x256xi32>
    %49 = arith.remsi %45, %48 : vector<8x256xi32>
    %c0_i32_15 = arith.constant 0 : i32
    %50 = vector.broadcast %c0_i32_15 : i32 to vector<8x256xi32>
    %51 = arith.cmpi ne, %49, %50 : vector<8x256xi32>
    %c0_i32_16 = arith.constant 0 : i32
    %52 = vector.broadcast %c0_i32_16 : i32 to vector<8x256xi32>
    %53 = arith.cmpi slt, %49, %52 : vector<8x256xi32>
    %c0_i32_17 = arith.constant 0 : i32
    %54 = arith.cmpi slt, %47, %c0_i32_17 : i32
    %55 = vector.broadcast %54 : i1 to vector<8x256xi1>
    %56 = vector.broadcast %55 : vector<8x256xi1> to vector<8x256xi1>
    %57 = arith.xori %53, %56 : vector<8x256xi1>
    %58 = arith.andi %57, %51 : vector<8x256xi1>
    %59 = vector.broadcast %47 : i32 to vector<8x256xi32>
    %60 = arith.addi %49, %59 : vector<8x256xi32>
    %61 = arith.select %58, %60, %49 : vector<8x256xi1>, vector<8x256xi32>
    %c0_i32_18 = arith.constant 0 : i32
    %62 = vector.broadcast %c0_i32_18 : i32 to vector<8x256xi32>
    %63 = arith.cmpi ne, %61, %62 : vector<8x256xi32>
    %64 = arith.andi %44, %63 : vector<8x256xi1>
    %65 = arith.subf %39, %1 : vector<8x256xf32>
    %66 = arith.mulf %65, %65 : vector<8x256xf32>
    %cst_19 = arith.constant 0.000000e+00 : f32
    %67 = vector.broadcast %cst_19 : f32 to vector<8x256xf32>
    %68 = arith.select %64, %66, %67 : vector<8x256xi1>, vector<8x256xf32>
    %69 = vector.shape_cast %68 : vector<8x256xf32> to vector<1x8x256xf32>
    %cst_20 = arith.constant dense<0.000000e+00> : vector<1xf32>
    %70 = vector.multi_reduction <add>, %69, %cst_20 [1, 2] : vector<1x8x256xf32> to vector<1xf32>
    %71 = vector.shape_cast %70 : vector<1xf32> to vector<1x1x1xf32>
    %72 = vector.extract %71[0, 0, 0] : f32 from vector<1x1x1xf32>
    %cst_21 = arith.constant 9.30059541E-5 : f32
    %73 = arith.mulf %21, %cst_21 : f32
    %cst_22 = arith.constant 8.68055576E-5 : f32
    %74 = arith.mulf %38, %cst_22 : f32
    %75 = arith.addf %73, %74 : f32
    %cst_23 = arith.constant 8.68055576E-5 : f32
    %76 = arith.mulf %72, %cst_23 : f32
    %77 = arith.addf %75, %76 : f32
    %c0_24 = arith.constant 0 : index
    %c0_25 = arith.constant 0 : index
    %c0_26 = arith.constant 0 : index
    %78 = vector.load %arg3[%c0_24, %c0_25, %c0_26] : memref<1x8x128xf32, #tpu.memory_space<vmem>>, vector<1x8x128xf32>
    %79 = vector.broadcast %77 : f32 to vector<1x8x128xf32>
    %80 = arith.addf %78, %79 : vector<1x8x128xf32>
    %c0_27 = arith.constant 0 : index
    %c0_28 = arith.constant 0 : index
    %c0_29 = arith.constant 0 : index
    %81 = vector.load %arg3[%c0_27, %c0_28, %c0_29] : memref<1x8x128xf32, #tpu.memory_space<vmem>>, vector<1x8x128xf32>
    tpu.vector_store %arg3[%c0_27, %c0_28, %c0_29], %80 {strides = array<i32>} : memref<1x8x128xf32, #tpu.memory_space<vmem>>, vector<1x8x128xf32>,
    return
  }
  func.func @transform_0(%arg0: i32, %arg1: i32) -> (i32, i32, i32) {
    %c0_i32 = arith.constant 0 : i32
    %c0_i32_0 = arith.constant 0 : i32
    return %arg0, %arg1, %c0_i32 : i32, i32, i32
  }
  func.func @transform_1(%arg0: i32, %arg1: i32) -> (i32, i32, i32) {
    %c0_i32 = arith.constant 0 : i32
    %c0_i32_0 = arith.constant 0 : i32
    %c0_i32_1 = arith.constant 0 : i32
    return %arg0, %c0_i32, %c0_i32_0 : i32, i32, i32
  }
}

</mosaic_0001>

<bundles_post_ra>
// kernel: tpu_custom_call.1
= control target key start
LH: loop header
LB: loop body
LE: loop exit
PB: predicated region body
PF: predicated region fallthrough
CT: control target
= control target key end

     0   :  { %6 = vsyncpa [#allocation4], 0  ;;  %s847_s0 = inlined_call_operand.hbm [shape: f32[6,8,256], index: 0, kind: input, shape index: {}]   ;;  %s848_s1 = inlined_call_operand.hbm [shape: f32[6,8,128], index: 1, kind: output, shape index: {}]  }
   0x1   :  { %8 = vsyncpa [#allocation4 + $0x1], 0 }
   0x2   :  { %9 = vsyncpa [#allocation5], 0 }
   0x3   :  { %11 = vsyncpa [#allocation5 + $0x1], 0  ;;  %s665_s6 = smov 0   ;;  %s667_s7 = smov 0  }
   0x4   :  { %s669_s8 = smov 0   ;;  %s671_s9 = smov 0  }
   0x5   :  { %s673_s10 = smov 0   ;;  %s675_s11 = smov 0  }
   0x6 LB: > { %s451_s12 = sadd.s32 4294967295, %s651_s11   ;;  %s452_s13 = sadd.s32 4294967294, %s651_s11   ;;  %s651_s11 = sphi %s675_s11, %s17_s11   ;;  %s647_s10 = sphi %s673_s10, %s859_s10   ;;  %s643_s9 = sphi %s671_s9, %s858_s9   ;;  %s639_s8 = sphi %s669_s8, %s857_s8   ;;  %s635_s7 = sphi %s667_s7, %s856_s7   ;;  %s631_s6 = sphi %s665_s6, %s855_s6  }
   0x7   : > { %s29_s14 = sadd.s32 1, %s647_s10  ;;  %s38_s15 = sadd.s32 1, %s639_s8 }
   0x8   : > { %p31_p0 = scmp.ge.s32.totalorder %s29_s14, 6  ;;  %p45_p1 = scmp.ne.s32.totalorder %s639_s8, %s635_s7 }
   0x9   : > { %p46_p2 = scmp.eq.s32.totalorder %s651_s11, 0  ;;  %p51_p3 = scmp.ne.s32.totalorder %s635_s7, %s631_s6 }
   0xa   : > { %s861_s14 = smov (%p31_p0, %s29_s14), 0  ;;  %p52_p5 = scmp.eq.s32.totalorder %s451_s12, 0 }
   0xb   : > { %p706_p4 = por %p46_p2, %p45_p1  ;;  %s33_s17 = ssub.s32 %s647_s10, %s861_s14 }
   0xc   : > { %p75_p6 = scmp.eq.s32.totalorder %s451_s12, 5  ;;  %p36_p7 = scmp.eq.s32.totalorder %s33_s17, 0 }
   0xd   : > { %p712_p8 = por %p52_p5, %p51_p3  ;;  %p81_p10 = scmp.eq.s32.totalorder %s452_s13, 5 }
   0xe   : > { %p716_p9 = por %p75_p6, %p45_p1  ;;  %p486_p12 = scmp.lt.s32.totalorder %s651_s11, 6 }
   0xf   : > { %s721_s20 = scalar_select %p36_p7, %s639_s8, %s38_s15  }
  0x10   : > { %p723_p11 = por %p81_p10, %p51_p3  ;;  %s101_s22 = sand.u32 1, %s639_s8  }
  0x11   : > { %s455_s23 = sshll.u32 %s101_s22, 4  ;;  %s465_s24 = sshll.u32 %s647_s10, 4 }
  0x12   : > { %s112_s27 = scalar_lea.hbm %s847_s0, %s465_s24  ;;  %s105_s28 = scalar_lea.vmem [#allocation3], %s455_s23 }
  0x13   : > { %s116_s29 = sshll.u32 %s105_s28, 4  ;;  %s114_s30 = sshll.u32 %s112_s27, 4  ;;  %s117_s29 = int_to_ptr.vmem [resolvable:$true] %s116_s29  ;;  %s115_s30 = int_to_ptr.hbm [resolvable:$true] %s114_s30 }
  0x14   : > { %p479_p13 = pnand %p486_p12, %p706_p4  ;;  %p458_p0 = scmp.ge.s32.totalorder %s651_s11, 1 }
  0x15   : > { %p121_p1 = scmp.lt.s32.totalorder %s651_s11, 7  ;;  %s102_s2 = scalar_lea.sflag [#allocation4], %s101_s22 }
  0x16   : > { %481 = dma.hbm_to_vmem [thread:$0]  (!%p479_p13), %s115_s30, 256, %s117_s29, %s102_s2  }
  0x17   : > { %p122_p2 = pnand %p458_p0, %p121_p1 }
  0x18   : > { %s738_s3 = sand.u32 (!%p122_p2), 1, %s635_s7  }
  0x19   : > { %125 = sbr.rel (%p122_p2) target bundleno = 365 (0x16d), region = 24  ;;  %s459_s4 = sshll.u32 (!%p122_p2), %s738_s3, 4 }
  0x1a   : > { %s128_s5 = scalar_lea.sflag (!%p122_p2), [#allocation4], %s738_s3  ;;  %s131_s12 = scalar_lea.vmem (!%p122_p2), [#allocation3], %s459_s4 }
  0x1e   : > { %v164_v0 = vlaneseq }
  0x1f   : > { %622 = dma.done.wait (%p712_p8), %s128_s5, 256  }
  0x20   : > { %624 = vsyncadd (%p712_p8), %s128_s5, 4294967040  ;;  %v746_v1 = vand.u32 127, %v164_v0  ;;  %s653_s13 = smov 112   ;;  %s654_s15 = smov 127   ;;  %v750_v2 = vld [vmem:[%s131_s12 + $0x8] sm:$0xff]  ;;  %v752_v3 = vld [vmem:[%s131_s12] sm:$0xff] }
  0x21   : > { %223 = vst [vmem:[#allocation1 + $0x9] sm:$0xff] %v750_v2  ;;  %235 = vrot.lane.b32.xlu2 %v752_v3, %s653_s13  ;;  %v160_v5 = vrot.slane %v750_v2, 7  ;;  %vm161_vm0 = vcmask 1040384   ;;  %vm768_vm1 = vcmp.lt.s32.totalorder %v164_v0, 256  ;;  %v194_v8 = vrot.slane %v752_v3, 7  ;;  %s460_s23 = sshll.u32 %s738_s3, 3 }
  0x22   : > { %242 = vrot.lane.b32.xlu1 %v746_v1, %s653_s13  ;;  %281 = vrot.lane.b32.xlu0 %v746_v1, %s654_s15  ;;  %v755_v4 = vadd.s32 128, %v746_v1  ;;  %222 = vst [vmem:[#allocation1] sm:$0xff] %v752_v3  ;;  %vm208_vm2 = vcmask 1046528   ;;  %vm239_vm3 = vcmp.lt.s32.totalorder %v746_v1, 112  ;;  %vm278_vm4 = vcmp.lt.s32.totalorder %v746_v1, 127  ;;  %s462_s25 = sshll.u32 %s643_s9, 3 }
  0x23   : > { %v162_v6 = vsel %vm161_vm0, %v752_v3, %v160_v5  ;;  %v198_v10 = vsub.f32 %v752_v3, %v194_v8  ;;  %v199_v11 = vsub.f32 %v750_v2, %v160_v5  ;;  %s365_s30 = scalar_lea.hbm %s848_s1, %s462_s25  ;;  %s150_s5 = scalar_lea.vmem [#allocation6], %s460_s23 }
  0x24   : > { %168 = vst.msk [vmem:[#allocation2] sm:$0x3] %vm768_vm1, %v162_v6  ;;  %s367_s12 = sshll.u32 %s150_s5, 4  ;;  %s368_s12 = int_to_ptr.vmem [resolvable:$true] %s367_s12 }
  0x25   : > { %v200_v14 = vmul.f32 %v198_v10, %v198_v10  ;;  %v201_v15 = vmul.f32 %v199_v11, %v199_v11 }
  0x27   : > { %v204_v18 = vrot.slane %v200_v14, 1  ;;  %v205_v19 = vrot.slane %v201_v15, 1 }
  0x29   : > { %237 = vrot.lane.b32.xlu2 %v750_v2, %s653_s13  ;;  %v209_v22 = vsel %vm208_vm2, %v204_v18, 0.0  ;;  %v210_v23 = vsel %vm208_vm2, %v205_v19, 0.0  ;;  %v225_v28 = vld [vmem:[#allocation1 + $0x7] ss:$9 sm:$0xff] }
  0x2a   : > { %244 = vrot.lane.b32.xlu1 %v755_v4, %s653_s13  ;;  %283 = vrot.lane.b32.xlu0 %v755_v4, %s654_s15  ;;  %v211_v26 = vadd.f32 %v210_v23, %v209_v22 }
  0x2b   : > { %v169_v9 = vld [vmem:[#allocation2] sm:$0x3] }
  0x2c   : > { %v171_v12 = vperm.slane %v169_v9, 0  ;;  %v172_v13 = vperm.slane %v169_v9, 1  ;;  %231 = vst.msk [vmem:[#allocation2] sm:$0x3] %vm768_vm1, %v225_v28 }
  0x2e   : > { %v175_v16 = vsub.f32 %v752_v3, %v171_v12  ;;  %v176_v17 = vsub.f32 %v750_v2, %v172_v13 }
  0x30   : > { %v177_v20 = vmul.f32 %v175_v16, %v175_v16  ;;  %v178_v21 = vmul.f32 %v176_v17, %v176_v17 }
  0x32   : > { %276 = vrot.lane.b32.xlu1 %v750_v2, %s654_s15  ;;  %274 = vrot.lane.b32.xlu0 %v752_v3, %s654_s15  ;;  %v180_v24 = vsel %vm161_vm0, %v177_v20, 0.0  ;;  %v181_v25 = vsel %vm161_vm0, %v178_v21, 0.0  ;;  %s369_s15 = sshll.u32 %s365_s30, 4  ;;  %s370_s15 = int_to_ptr.hbm [resolvable:$true] %s369_s15 }
  0x33   : > { %v182_v27 = vadd.f32 %v181_v25, %v180_v24 }
  0x52   : > { %183 = vadd.xlane.f32.xlu2 %v182_v27 }
  0x5c   : > { %212 = vadd.xlane.f32.xlu0 %v211_v26 }
  0x7b   : > { %v236_v29 = vpop.permute.xlu2 %235 }
  0x83   : > { %v238_v32 = vpop.permute.xlu2 %237 }
  0x84   : > { %v240_v33 = vsel %vm239_vm3, %v236_v29, %v238_v32  ;;  %v241_v34 = vsel %vm239_vm3, %v238_v32, %v236_v29 }
  0x85   : > { %v258_v37 = vsub.f32 %v240_v33, %v752_v3  ;;  %v259_v38 = vsub.f32 %v241_v34, %v750_v2 }
  0x87   : > { %v260_v47 = vmul.f32 %v258_v37, %v258_v37  ;;  %v261_v48 = vmul.f32 %v259_v38, %v259_v38 }
  0x94   : > { %v243_v30 = vpop.permute.xlu1 %242  ;;  %v282_v31 = vpop.permute.xlu0 %281 }
  0x9c   : > { %v245_v35 = vpop.permute.xlu1 %244  ;;  %v284_v36 = vpop.permute.xlu0 %283 }
  0x9d   : > { %v246_v39 = vsel %vm239_vm3, %v243_v30, %v245_v35  ;;  %v247_v40 = vsel %vm239_vm3, %v245_v35, %v243_v30  ;;  %v285_v41 = vsel %vm278_vm4, %v282_v31, %v284_v36  ;;  %v286_v42 = vsel %vm278_vm4, %v284_v36, %v282_v31 }
  0x9e   : > { %v248_v43 = vsub.s32 %v246_v39, %v746_v1  ;;  %v249_v44 = vsub.s32 %v247_v40, %v755_v4  ;;  %vm297_vm5 = vcmp.gt.s32.totalorder %v285_v41, %v746_v1  ;;  %vm299_vm6 = vcmp.gt.s32.totalorder %v286_v42, %v755_v4 }
  0x9f   : > { %v298_v49 = vsel %vm297_vm5, %v285_v41, %v746_v1  ;;  %v300_v50 = vsel %vm299_vm6, %v286_v42, %v755_v4  ;;  %v287_v53 = vsub.s32 %v285_v41, %v746_v1  ;;  %v288_v54 = vsub.s32 %v286_v42, %v755_v4 }
  0xa0   : > { %v251_v45 = vsub.s32 0, %v248_v43  ;;  %v254_v46 = vsub.s32 0, %v249_v44  ;;  %vm250_vm7 = vcmp.lt.s32.totalorder %v248_v43, 0  ;;  %vm253_vm8 = vcmp.lt.s32.totalorder %v249_v44, 0 }
  0xa1   : > { %vm301_vm9 = vcmp.lt.s32.totalorder %v298_v49, 0  ;;  %v302_v51 = vsub.s32 0, %v298_v49  ;;  %vm308_vm10 = vcmp.lt.s32.totalorder %v300_v50, 0  ;;  %v309_v52 = vsub.s32 0, %v300_v50 }
  0xa2   : > { %v252_v55 = vsel %vm250_vm7, %v251_v45, %v248_v43  ;;  %v255_v56 = vsel %vm253_vm8, %v254_v46, %v249_v44  ;;  %v290_v6 = vsub.s32 0, %v287_v53  ;;  %v293_v10 = vsub.s32 0, %v288_v54 }
  0xa3   : > { %v303_v57 = vsel %vm301_vm9, %v302_v51, %v298_v49  ;;  %v310_v58 = vsel %vm308_vm10, %v309_v52, %v300_v50  ;;  %vm256_vm11 = vcmp.eq.s32.totalorder %v252_v55, 16  ;;  %vm257_vm12 = vcmp.eq.s32.totalorder %v255_v56, 16 }
  0xa4   : > { %v277_v59 = vpop.permute.xlu1 %276  ;;  %v275_v60 = vpop.permute.xlu0 %274  ;;  %v305_v61 = vand.u32 15, %v303_v57  ;;  %v312_v62 = vand.u32 15, %v310_v58  ;;  %v262_v5 = vsel %vm256_vm11, %v260_v47, 0.0  ;;  %v263_v4 = vsel %vm257_vm12, %v261_v48, 0.0 }
  0xa5   : > { %v279_v63 = vsel %vm278_vm4, %v275_v60, %v277_v59  ;;  %v280_v0 = vsel %vm278_vm4, %v277_v59, %v275_v60  ;;  %v264_v9 = vadd.f32 %v263_v4, %v262_v5  ;;  %vm289_vm13 = vcmp.lt.s32.totalorder %v287_v53, 0 }
  0xa6   : > { %v306_v7 = vsub.s32 0, %v305_v61  ;;  %v313_v8 = vsub.s32 0, %v312_v62  ;;  %v329_v11 = vsub.f32 %v279_v63, %v752_v3  ;;  %v330_v14 = vsub.f32 %v280_v0, %v750_v2 }
  0xa7   : > { %265 = vadd.xlane.f32.xlu1 %v264_v9  ;;  %vm292_vm14 = vcmp.lt.s32.totalorder %v288_v54, 0  ;;  %v291_v1 = vsel %vm289_vm13, %v290_v6, %v287_v53 }
  0xa8   : > { %v307_v12 = vsel %vm301_vm9, %v306_v7, %v305_v61  ;;  %v314_v13 = vsel %vm308_vm10, %v313_v8, %v312_v62  ;;  %v331_v17 = vmul.f32 %v329_v11, %v329_v11  ;;  %v294_v18 = vsel %vm292_vm14, %v293_v10, %v288_v54 }
  0xa9   : > { %vm315_vm15 = vcmp.ne.s32.totalorder %v307_v12, 0  ;;  %vm316_vm0 = vcmp.ne.s32.totalorder %v314_v13, 0  ;;  %vm317_vm1 = vcmp.lt.s32.totalorder %v307_v12, 0  ;;  %vm318_vm2 = vcmp.lt.s32.totalorder %v314_v13, 0 }
  0xaa   : > { %vm319_vm3 = vmand %vm317_vm1, %vm315_vm15  ;;  %v321_v15 = vadd.s32 16, %v307_v12  ;;  %v322_v16 = vadd.s32 16, %v314_v13  ;;  %v332_v3 = vmul.f32 %v330_v14, %v330_v14  ;;  %vm295_vm5 = vcmp.eq.s32.totalorder %v291_v1, 1 }
  0xab   : > { %vm320_vm4 = vmand %vm318_vm2, %vm316_vm0  ;;  %vm296_vm8 = vcmp.eq.s32.totalorder %v294_v18, 1 }
  0xac   : > { %v323_v19 = vsel %vm319_vm3, %v321_v15, %v307_v12  ;;  %v324_v20 = vsel %vm320_vm4, %v322_v16, %v314_v13 }
  0xad   : > { %vm325_vm6 = vcmp.ne.s32.totalorder %v323_v19, 0  ;;  %vm326_vm7 = vcmp.ne.s32.totalorder %v324_v20, 0 }
  0xae   : > { %vm327_vm9 = vmand %vm295_vm5, %vm325_vm6 }
  0xaf   : > { %vm328_vm10 = vmand %vm296_vm8, %vm326_vm7  ;;  %v333_v2 = vsel %vm327_vm9, %v331_v17, 0.0 }
  0xb0   : > { %v334_v21 = vsel %vm328_vm10, %v332_v3, 0.0 }
  0xb1   : > { %v335_v22 = vadd.f32 %v334_v21, %v333_v2 }
  0xb3   : > { %336 = vadd.xlane.f32.xlu2 %v335_v22 }
  0xc5   : > { %v184_v24 = vpop.xlane.xlu2 %183 }
  0xc6   : > { %v185_v26 = vrot.slane %v184_v24, 4 }
  0xc8   : > { %v186_v28 = vadd.f32 %v185_v26, %v184_v24 }
  0xca   : > { %v187_v30 = vrot.slane %v186_v28, 2 }
  0xcc   : > { %v188_v32 = vadd.f32 %v187_v30, %v186_v28 }
  0xce   : > { %v189_v34 = vrot.slane %v188_v32, 1 }
  0xcf   : > { %v213_v23 = vpop.xlane.xlu0 %212 }
  0xd0   : > { %v214_v25 = vrot.slane %v213_v23, 4  ;;  %v190_v36 = vadd.f32 %v189_v34, %v188_v32 }
  0xd2   : > { %v215_v27 = vadd.f32 %v214_v25, %v213_v23  ;;  %466 = vpush %v190_v36 }
  0xd4   : > { %v216_v29 = vrot.slane %v215_v27, 2 }
  0xd6   : > { %v217_v31 = vadd.f32 %v216_v29, %v215_v27 }
  0xd8   : > { %v218_v33 = vrot.slane %v217_v31, 1 }
  0xda   : > { %v219_v35 = vadd.f32 %v218_v33, %v217_v31 }
  0xdc   : > { %468 = vpush %v219_v35 }
 0x103   : > { %s467_s16 = spop %466 }
 0x10d   : > { %s469_s17 = spop %468 }
 0x10e   : > { %s221_s22 = sadd.f32 %s469_s17, %s467_s16  ;;  %s355_s16 = scalar_lea.sflag [#allocation5], %s738_s3 }
 0x10f   : > { %s583_s17 = sshra.s32 %s370_s15, 4  ;;  %s584_s17 = int_to_ptr.hbm [resolvable:$true] %s583_s17 }
 0x110   : > { %s345_s26 = smul.f32 9.3005954e-05, %s221_s22  ;;  %s585_s9 = scalar_lea.hbm %s584_s17, 8 }
 0x111   : > { %p586_p3 = scmp.ne.s32.totalorder %s584_s17, %s585_s9  ;;  %p590_p6 = scmp.lt.s32.totalorder %s584_s17, %s848_s1 }
 0x113   : > { %p587_p4 = pnand %p586_p3, %p716_p9 }
 0x115   : > { %p588_p5 = pneg %p587_p4 }
 0x11a   : > { %v266_v37 = vpop.xlane.xlu1 %265 }
 0x11b   : > { %v267_v38 = vrot.slane %v266_v37, 4 }
 0x11d   : > { %v268_v39 = vadd.f32 %v267_v38, %v266_v37 }
 0x11f   : > { %v269_v40 = vrot.slane %v268_v39, 2 }
 0x121   : > { %v270_v41 = vadd.f32 %v269_v40, %v268_v39 }
 0x123   : > { %v271_v42 = vrot.slane %v270_v41, 1 }
 0x125   : > { %v272_v44 = vadd.f32 %v271_v42, %v270_v41 }
 0x126   : > { %v337_v43 = vpop.xlane.xlu2 %336 }
 0x127   : > { %v338_v45 = vrot.slane %v337_v43, 4  ;;  %470 = vpush %v272_v44 }
 0x129   : > { %v339_v46 = vadd.f32 %v338_v45, %v337_v43 }
 0x12b   : > { %v340_v47 = vrot.slane %v339_v46, 2 }
 0x12d   : > { %v341_v48 = vadd.f32 %v340_v47, %v339_v46 }
 0x12f   : > { %v342_v49 = vrot.slane %v341_v48, 1 }
 0x131   : > { %v343_v50 = vadd.f32 %v342_v49, %v341_v48 }
 0x133   : > { %472 = vpush %v343_v50 }
 0x158   : > { %s471_s18 = spop %470 }
 0x159   : > { %s346_s24 = smul.f32 8.680556e-05, %s471_s18 }
 0x15b   : > { %s347_s2 = sadd.f32 %s346_s24, %s345_s26  ;;  %s589_s24 = scalar_lea.hbm %s848_s1, 48 }
 0x15c   : > { %p591_p7 = scmp.lt.s32.totalorder %s589_s24, %s585_s9 }
 0x15e   : > { %p592_p8 = por %p591_p7, %p590_p6 }
 0x160   : > { %p593_p10 = pnand %p592_p8, %p588_p5 }
 0x164   : > { %s473_s27 = spop %472 }
 0x165   : > { %s348_s4 = smul.f32 8.680556e-05, %s473_s27 }
 0x167   : > { %s349_s13 = sadd.f32 %s348_s4, %s347_s2 }
 0x169   : > { %v351_v51 = vstv %s349_s13 }
 0x16a   : > { %353 = vst [vmem:[%s150_s5] sm:$0xff] %v351_v51 }
 0x16b   : > { %596 = shalt.err (!%p593_p10)
}
 0x16c   : > { %476 = dma.vmem_to_hbm [thread:$0]  (%p716_p9), %s368_s12, 128, %s370_s15, %s355_s16  }
 0x16d PF: > { %p487_p12 = scmp.ge.s32.totalorder %s651_s11, 2  ;;  %s381_s3 = sand.u32 1, %s631_s6  }
 0x16e   : > { %s382_s26 = scalar_lea.sflag [#allocation5], %s381_s3 }
 0x16f   : > { %p483_p13 = pnand %p487_p12, %p723_p11 }
 0x171   : > { %p484_p0 = pneg %p483_p13 }
 0x173   : > { %626 = dma.done.wait (%p484_p0), %s382_s26, 128  }
 0x174   : > { %628 = vsyncadd (%p484_p0), %s382_s26, 4294967168  ;;  %s17_s11 = sadd.s32 1, %s651_s11   ;;  %s855_s6 = smov %s635_s7 }
 0x175   : > { %p14_p1 = scmp.ge.s32.totalorder %s17_s11, 8   ;;  %s856_s7 = smov %s639_s8 }
 0x176   : > { %s857_s8 = smov %s721_s20  ;;  %s858_s9 = smov %s647_s10 }
 0x177   : > { %s859_s10 = smov %s861_s14  ;;  %16 = sbr.rel (!%p14_p1) target bundleno = 6 (0x6), region = 74 }
 0x17c   :  { %388 = vsyncpa [#allocation4], 1 }
 0x17d   :  { %390 = vsyncpa [#allocation4 + $0x1], 1 }
 0x17e   :  { %391 = vsyncpa [#allocation5], 1 }
 0x17f   :  { %393 = vsyncpa [#allocation5 + $0x1], 1 }

</bundles_post_ra>
